<compile_context>
chip_gen: v7x
topology: tpu7x:2x2x1
jax: 0.10.0
libtpu: 0.0.40
codegen_flags: <defaults>
</compile_context>

<pallas_src>
import jax
import jax.numpy as jnp
import numpy as np
from jax.experimental import pallas as pl
from jax.experimental.pallas import tpu as pltpu


# ----------------------------------------------------------------------------
# Tuning knobs
# ----------------------------------------------------------------------------
# Per-grid-step block budget (input + output bytes). Pallas double-buffers each
# operand, so peak VMEM ~= 2 * budget; keep well under v7x's 64 MiB VMEM.
_BLOCK_BUDGET_BYTES = 12 << 20
_VMEM_LIMIT_BYTES = 48 << 20


# ----------------------------------------------------------------------------
# Kernels — flattened (rows, H*W) layout (lane-dense, preferred)
# ----------------------------------------------------------------------------
def _pad_flat_kernel(x_ref, o_ref):
    """o[:, :L_in] = x ; o[:, L_in:] = 0.  Each output region stored exactly once."""
    l_in = x_ref.shape[1]
    o_ref[:, :l_in] = x_ref[...]
    o_ref[:, l_in:] = jnp.zeros(
        (o_ref.shape[0], o_ref.shape[1] - l_in), o_ref.dtype
    )


def _crop_flat_kernel(x_ref, o_ref):
    """o = x[:, :L_out] (input block may already be trimmed to exactly L_out)."""
    o_ref[...] = x_ref[:, : o_ref.shape[1]]


# ----------------------------------------------------------------------------
# Kernels — (rows, H, W) layout (fallback: always layout-legal, smaller blocks)
# ----------------------------------------------------------------------------
def _pad_rows_kernel(x_ref, o_ref):
    h_in = x_ref.shape[1]
    o_ref[:, :h_in, :] = x_ref[...]
    o_ref[:, h_in:, :] = jnp.zeros(
        (o_ref.shape[0], o_ref.shape[1] - h_in, o_ref.shape[2]), o_ref.dtype
    )


def _crop_rows_kernel(x_ref, o_ref):
    o_ref[...] = x_ref[:, : o_ref.shape[1], :]


# ----------------------------------------------------------------------------
# Block-size selection
# ----------------------------------------------------------------------------
def _rows_per_block_flat(n_rows, bytes_per_row):
    """Largest layout-legal row block for the flat (rows, H*W) layout, or None.

    Legal row-block sizes are multiples of 8 (sublane tile) or the full row
    extent.  Prefer the largest multiple-of-8 divisor that fits the VMEM budget
    and still leaves >= 2 grid steps (keeps both v7x TensorCores busy);
    otherwise a single full-extent block; otherwise None (use the 3-D fallback).
    """
    max_rows = _BLOCK_BUDGET_BYTES // max(bytes_per_row, 1)
    best = None
    rb = 8
    while rb <= min(n_rows, max_rows):
        if n_rows % rb == 0 and n_rows // rb >= 2:
            best = rb
        rb += 8
    if best is not None:
        return best
    if n_rows <= max_rows:
        return n_rows
    return None


def _rows_per_block_3d(n_rows, bytes_per_row):
    """Largest divisor of n_rows whose (rows, H, W) block fits the budget (>= 1)."""
    max_rows = max(1, _BLOCK_BUDGET_BYTES // max(bytes_per_row, 1))
    rb = min(n_rows, max_rows)
    while n_rows % rb != 0:
        rb -= 1
    return rb


# ----------------------------------------------------------------------------
# Pallas wrappers
# ----------------------------------------------------------------------------
def _pad_or_crop(x, h_out, flat_kernel, rows_kernel, trim_in_elems=None):
    """Run bottom-pad (h_out > H) or bottom-crop (h_out < H) over NCHW `x`."""
    N, C, H, W = x.shape
    R, L_in, L_out = N * C, H * W, h_out * W
    itemsize = x.dtype.itemsize
    bytes_per_row = (L_in + L_out) * itemsize

    compiler_params = pltpu.CompilerParams(
        dimension_semantics=("parallel",),
        vmem_limit_bytes=_VMEM_LIMIT_BYTES,
    )

    rb = _rows_per_block_flat(R, bytes_per_row)
    if rb is not None:
        # Lane-dense flattened path: each grid step moves a (rb, H*W) slab.
        l_in_block = L_in
        if (
            trim_in_elems is not None
            and trim_in_elems < L_in
            and trim_in_elems % 128 == 0
            and rb % 8 == 0
        ):
            # Crop path: only DMA the kept prefix of each row (layout-legal here).
            l_in_block = trim_in_elems
        x2 = x.reshape(R, L_in)
        out = pl.pallas_call(
            flat_kernel,
            out_shape=jax.ShapeDtypeStruct((R, L_out), x.dtype),
            grid=(R // rb,),
            in_specs=[pl.BlockSpec((rb, l_in_block), lambda i: (i, 0))],
            out_specs=pl.BlockSpec((rb, L_out), lambda i: (i, 0)),
            compiler_params=compiler_params,
        )(x2)
        return out.reshape(N, C, h_out, W)

    # Fallback: (rows, H, W) blocks — last two dims are full extents, so this is
    # legal for any row count while keeping each block inside the VMEM budget.
    rb = _rows_per_block_3d(R, bytes_per_row)
    x3 = x.reshape(R, H, W)
    out = pl.pallas_call(
        rows_kernel,
        out_shape=jax.ShapeDtypeStruct((R, h_out, W), x.dtype),
        grid=(R // rb,),
        in_specs=[pl.BlockSpec((rb, H, W), lambda i: (i, 0, 0))],
        out_specs=pl.BlockSpec((rb, h_out, W), lambda i: (i, 0, 0)),
        compiler_params=compiler_params,
    )(x3)
    return out.reshape(N, C, h_out, W)


def pad_bottom(x, pad_size):
    """Equivalent of nn.functional.pad(x, (0, 0, 0, pad_size)) for NCHW."""
    if pad_size == 0:
        return x
    if pad_size < 0:
        # F.pad with a negative pad crops; mirror that semantics.
        return crop_bottom(x, -pad_size)
    N, C, H, W = x.shape
    return _pad_or_crop(x, H + pad_size, _pad_flat_kernel, _pad_rows_kernel)


def crop_bottom(x, crop_size):
    """Equivalent of x[:, :, :-crop_size] for NCHW, crop_size > 0."""
    if crop_size <= 0:
        return x
    N, C, H, W = x.shape
    h_out = H - crop_size
    return _pad_or_crop(
        x, h_out, _crop_flat_kernel, _crop_rows_kernel, trim_in_elems=h_out * W
    )


# ----------------------------------------------------------------------------
# Module
# ----------------------------------------------------------------------------
class NimbroNetBase:
    """
    Base class from which all NimbRoNet models inherit (Pallas/TPU version).
    """

    IMG_SIZE = (540, 960)

    def __init__(self):
        # No parameters in the base class.
        return

    def forward(self, x):
        """Forward pass"""
        # TODO(synk): base class defines no forward in PyTorch either (raises).
        raise NotImplementedError("Base class does not implement 'forward' method'")

    def _init_parameters(self):
        """Initializing model parameters"""
        raise NotImplementedError(
            "Base class does not implement '_init_parameters' method'"
        )

    @staticmethod
    def _pad_size(H):
        return int(H / 32.0 + 0.5) * 32 - H

    def _add_padding(self, x, H):
        """
        Adding padding to handle sizes not divisible by 32
        """
        pad_size = self._pad_size(H)
        return pad_bottom(x, pad_size)

    def _remove_padding(self, outs, H):
        """
        Removing the extra padding added to handle sizes not divisible by 32
        """
        # NOTE: mirrors the PyTorch code exactly — every output is cropped by
        # pad_size_lr, gated only on pad_size_hr > 0 (likely an upstream quirk).
        pad_size = self._pad_size(H)
        pad_size_lr, pad_size_hr = (int(pad_size / 4.0), int(pad_size / 2.0))
        if pad_size_hr > 0:
            outs = [crop_bottom(out, pad_size_lr) for out in outs]
        return outs


# ----------------------------------------------------------------------------
# Demo / self-check
# ----------------------------------------------------------------------------
if __name__ == "__main__":
    key = jax.random.PRNGKey(0)
    k1, k2, k3 = jax.random.split(key, 3)

    model = NimbroNetBase()

    # --- _add_padding via Pallas kernel (single-block grid) ---
    N, C, H, W = 2, 4, 16, 16
    x = jax.random.normal(k1, (N, C, H, W), dtype=jnp.float32)
    padded = jax.block_until_ready(model._add_padding(x, H))

    pad_size = NimbroNetBase._pad_size(H)  # 16 for H=16
    ref_padded = jnp.pad(x, ((0, 0), (0, 0), (0, pad_size), (0, 0)))
    assert padded.shape == ref_padded.shape, (padded.shape, ref_padded.shape)
    np.testing.assert_allclose(
        np.asarray(padded), np.asarray(ref_padded), rtol=0, atol=0
    )

    # --- _remove_padding via Pallas kernel (low-res head output) ---
    H_lr = (H + pad_size) // 4
    out_lr = jax.random.normal(k2, (N, C, H_lr, W // 2), dtype=jnp.float32)
    cropped = jax.block_until_ready(model._remove_padding([out_lr], H)[0])

    pad_size_lr = int(pad_size / 4.0)
    ref_cropped = out_lr[:, :, :-pad_size_lr] if pad_size_lr > 0 else out_lr
    assert cropped.shape == ref_cropped.shape, (cropped.shape, ref_cropped.shape)
    np.testing.assert_allclose(
        np.asarray(cropped), np.asarray(ref_cropped), rtol=0, atol=0
    )

    # --- larger channel count: exercises the multi-step (batched rows) grid ---
    N2, C2 = 2, 16
    x2 = jax.random.normal(k3, (N2, C2, H, W), dtype=jnp.float32)
    padded2 = jax.block_until_ready(model._add_padding(x2, H))
    ref_padded2 = jnp.pad(x2, ((0, 0), (0, 0), (0, pad_size), (0, 0)))
    np.testing.assert_allclose(
        np.asarray(padded2), np.asarray(ref_padded2), rtol=0, atol=0
    )
    cropped2 = jax.block_until_ready(crop_bottom(padded2, pad_size))
    np.testing.assert_allclose(np.asarray(cropped2), np.asarray(x2), rtol=0, atol=0)

    print("KERNEL_OK")
</pallas_src>

<mosaic_0001>
module attributes {stable_mosaic.version = 11 : i64} {
  func.func @_pad_flat_kernel(%arg0: i32, %arg1: memref<8x256xf32, #tpu.memory_space<vmem>>, %arg2: memref<8x512xf32, #tpu.memory_space<vmem>>) attributes {dimension_semantics = [#tpu.dimension_semantics<parallel>], iteration_bounds = array<i64: 1>, scalar_prefetch = 0 : i64, scratch_operands = 0 : i64, tpu.core_type = #tpu.core_type<tc>, window_params = [{transform_indices = @transform_0, window_bounds = array<i64: 8, 256>}, {transform_indices = @transform_1, window_bounds = array<i64: 8, 512>}]} {
    %c0 = arith.constant 0 : index
    %c0_0 = arith.constant 0 : index
    %0 = vector.load %arg1[%c0, %c0_0] : memref<8x256xf32, #tpu.memory_space<vmem>>, vector<8x256xf32>
    %c0_1 = arith.constant 0 : index
    %c0_2 = arith.constant 0 : index
    %1 = vector.load %arg2[%c0_1, %c0_2] : memref<8x512xf32, #tpu.memory_space<vmem>>, vector<8x256xf32>
    tpu.vector_store %arg2[%c0_1, %c0_2], %0 {strides = array<i32>} : memref<8x512xf32, #tpu.memory_space<vmem>>, vector<8x256xf32>,
    %cst = arith.constant 0.000000e+00 : f32
    %2 = vector.broadcast %cst : f32 to vector<8x256xf32>
    %c0_3 = arith.constant 0 : index
    %c256 = arith.constant 256 : index
    %3 = vector.load %arg2[%c0_3, %c256] : memref<8x512xf32, #tpu.memory_space<vmem>>, vector<8x256xf32>
    tpu.vector_store %arg2[%c0_3, %c256], %2 {strides = array<i32>} : memref<8x512xf32, #tpu.memory_space<vmem>>, vector<8x256xf32>,
    return
  }
  func.func @transform_0(%arg0: i32) -> (i32, i32) {
    %c0_i32 = arith.constant 0 : i32
    %c0_i32_0 = arith.constant 0 : i32
    return %arg0, %c0_i32 : i32, i32
  }
  func.func @transform_1(%arg0: i32) -> (i32, i32) {
    %c0_i32 = arith.constant 0 : i32
    %c0_i32_0 = arith.constant 0 : i32
    return %arg0, %c0_i32 : i32, i32
  }
}

</mosaic_0001>

<bundles_post_ra>
// kernel: tpu_custom_call.1
= control target key start
LH: loop header
LB: loop body
LE: loop exit
PB: predicated region body
PF: predicated region fallthrough
CT: control target
= control target key end

     0   :  { %6 = vsyncpa [#allocation3], 0  ;;  %s130_s0 = inlined_call_operand.hbm [shape: f32[8,256], index: 0, kind: input, shape index: {}]   ;;  %s131_s1 = inlined_call_operand.hbm [shape: f32[8,512], index: 1, kind: output, shape index: {}]  }
   0x1   :  { %7 = vsyncpa [#allocation4], 0  ;;  %s93_s6 = smov [#allocation2]   ;;  %s45_s10 = scalar_lea.hbm %s130_s0, 256 }
   0x2   :  { %s14_s7 = sshll.u32 %s93_s6, 4  ;;  %p46_p0 = scmp.ne.s32.totalorder %s130_s0, %s45_s10  ;;  %s15_s7 = int_to_ptr.vmem [resolvable:$true] %s14_s7 }
   0x3   :  { %p49_p1 = scmp.lt.u32.totalorder %s45_s10, %s130_s0 }
   0x5   :  { %p51_p2 = pnand %p49_p1, %p46_p0 }
   0x7   :  { %54 = shalt.err (!%p51_p2)
}
   0x8   :  { %s55_s15 = scalar_lea.vmem %s15_s7, 256  ;;  %p60_p4 = scmp.lt.s32.totalorder %s15_s7, %s15_s7 }
   0x9   :  { %p56_p3 = scmp.ne.s32.totalorder %s15_s7, %s55_s15  ;;  %p61_p5 = scmp.lt.s32.totalorder %s55_s15, %s55_s15 }
   0xb   :  { %p62_p6 = por %p61_p5, %p60_p4 }
   0xd   :  { %p63_p7 = pnand %p62_p6, %p56_p3 }
   0xf   :  { %66 = shalt.err (!%p63_p7)
}
  0x10   :  { %17 = dma.hbm_to_vmem [thread:$0]  %s130_s0, 256, %s15_s7, [#allocation3]  }
  0x11   :  { %89 = dma.done.wait [#allocation3], 256  }
  0x12   :  { %90 = vsyncadd [#allocation3], 4294967040  ;;  %v94_v0 = vmov 0.0   ;;  %s95_s18 = smov [#allocation5]   ;;  %v21_v1 = vld [vmem:[#allocation2] sm:$0xff]  ;;  %v22_v2 = vld [vmem:[#allocation2 + $0x8] sm:$0xff] }
  0x13   :  { %25 = vst [vmem:[#allocation5 + $0x10] sm:$0xff] %v94_v0  ;;  %26 = vst [vmem:[#allocation5 + $0x18] sm:$0xff] %v94_v0  ;;  %s33_s19 = sshll.u32 %s95_s18, 4  ;;  %s34_s19 = int_to_ptr.vmem [resolvable:$true] %s33_s19 }
  0x14   :  { %23 = vst [vmem:[#allocation5] sm:$0xff] %v21_v1  ;;  %24 = vst [vmem:[#allocation5 + $0x8] sm:$0xff] %v22_v2  ;;  %s67_s20 = scalar_lea.vmem %s34_s19, 512  ;;  %p72_p9 = scmp.lt.s32.totalorder %s34_s19, %s34_s19 }
  0x15   :  { %p68_p8 = scmp.ne.s32.totalorder %s34_s19, %s67_s20  ;;  %p73_p10 = scmp.lt.s32.totalorder %s67_s20, %s67_s20 }
  0x17   :  { %p74_p11 = por %p73_p10, %p72_p9 }
  0x19   :  { %p75_p12 = pnand %p74_p11, %p68_p8 }
  0x1b   :  { %78 = shalt.err (!%p75_p12)
}
  0x1c   :  { %s79_s22 = scalar_lea.hbm %s131_s1, 512 }
  0x1d   :  { %p80_p13 = scmp.ne.s32.totalorder %s131_s1, %s79_s22  ;;  %p83_p0 = scmp.lt.u32.totalorder %s79_s22, %s131_s1 }
  0x1f   :  { %p85_p1 = pnand %p83_p0, %p80_p13 }
  0x21   :  { %88 = shalt.err (!%p85_p1)
}
  0x22   :  { %36 = dma.vmem_to_hbm [thread:$0]  %s34_s19, 512, %s131_s1, [#allocation4]  }
  0x23   :  { %91 = dma.done.wait [#allocation4], 512  }
  0x24   :  { %92 = vsyncadd [#allocation4], 4294966784 }
  0x25   :  { %40 = vsyncpa [#allocation3], 1 }
  0x26   :  { %41 = vsyncpa [#allocation4], 1 }

</bundles_post_ra>
